<compile_context>
chip_gen: v7x
topology: tpu7x:2x2x1
jax: 0.10.0
libtpu: 0.0.40
codegen_flags: <defaults>
</compile_context>

<pallas_src>
import jax
import jax.numpy as jnp
from jax.experimental import pallas as pl
from jax.experimental.pallas import tpu as pltpu

SUBLANE = 8  # second-to-last-dim granularity


def _round_up(x, m):
    return (x + m - 1) // m * m


def mlp_kernel(x_ref, w1_ref, b1_ref, w2_ref, b2_ref, o_ref):
    # All operands f32; both dots accumulate in f32 on the MXU.
    x = x_ref[...]                                                    # [TM, Cin]
    h = jnp.dot(x, w1_ref[...], preferred_element_type=jnp.float32)  # [TM, Cout]
    h = jnp.maximum(h + b1_ref[...], 0.0)                            # bias + ReLU (VPU)
    y = jnp.dot(h, w2_ref[...], preferred_element_type=jnp.float32)  # [TM, Cout]
    y = y + b2_ref[...]
    o_ref[...] = y.astype(o_ref.dtype)


def mlp_forward(x, w1, b1, w2, b2, *, block_rows=1024):
    """x: [N, Cin] f32, w1: [Cin, Cout], b1: [1, Cout], w2: [Cout, Cout], b2: [1, Cout].

    Weights are stored as [in, out] (transpose of PyTorch nn.Linear layout) so the
    kernel computes x @ W + b directly.  Returns [N, Cout] in x.dtype.
    """
    n, cin = x.shape
    cout = w1.shape[1]
    assert w1.shape == (cin, cout)
    assert w2.shape == (cout, cout)
    assert b1.shape == (1, cout) and b2.shape == (1, cout)

    # --- row tile: sublane-aligned, large, but with >=2 parallel grid steps when
    #     possible so both TensorCores on v7x get work (harmless on v5e/v6e). ---
    tm = min(block_rows, _round_up(n, SUBLANE))
    if n > SUBLANE:
        tm = min(tm, _round_up(-(-n // 2), SUBLANE))
    tm = max(tm, SUBLANE)
    tm = _round_up(tm, SUBLANE)

    n_p = _round_up(n, tm)
    if n_p != n:
        # Zero-fill only the row tail; no feature-dim padding, no dtype pre-pass.
        x_in = jnp.zeros((n_p, cin), x.dtype).at[:n, :].set(x)
    else:
        x_in = x

    grid = (n_p // tm,)

    flops = 2 * n * (cin * cout + cout * cout)
    bytes_accessed = (
        x_in.size * x_in.dtype.itemsize
        + (w1.size + w2.size + b1.size + b2.size) * 4
        + n_p * cout * x.dtype.itemsize
    )
    cost = pl.CostEstimate(flops=flops, transcendentals=0,
                           bytes_accessed=bytes_accessed)

    out_p = pl.pallas_call(
        mlp_kernel,
        out_shape=jax.ShapeDtypeStruct((n_p, cout), x.dtype),
        grid_spec=pltpu.PrefetchScalarGridSpec(
            num_scalar_prefetch=0,
            grid=grid,
            in_specs=[
                # x: streamed per row-tile; last dim == full Cin (legal, no lane pad).
                pl.BlockSpec((tm, cin), lambda i: (i, 0)),
                # weights / biases: VMEM-resident across all grid steps.
                pl.BlockSpec((cin, cout), lambda i: (0, 0)),
                pl.BlockSpec((1, cout), lambda i: (0, 0)),
                pl.BlockSpec((cout, cout), lambda i: (0, 0)),
                pl.BlockSpec((1, cout), lambda i: (0, 0)),
            ],
            # Output last dim == full Cout -> no post-kernel lane slice / copy pass.
            out_specs=pl.BlockSpec((tm, cout), lambda i: (i, 0)),
        ),
        compiler_params=pltpu.CompilerParams(
            # Row tiles are independent -> shard across TCs on v7x; no-op on v5e/v6e.
            dimension_semantics=("parallel",),
        ),
        cost_estimate=cost,
    )(x_in, w1, b1, w2, b2)

    return out_p if n_p == n else out_p[:n]


def init_linear_params(key, fan_in, fan_out, dtype=jnp.float32):
    # Mimics PyTorch nn.Linear default init: uniform(-1/sqrt(fan_in), +1/sqrt(fan_in)).
    kw, kb = jax.random.split(key)
    bound = 1.0 / (fan_in ** 0.5)
    w = jax.random.uniform(kw, (fan_in, fan_out), dtype, minval=-bound, maxval=bound)
    b = jax.random.uniform(kb, (1, fan_out), dtype, minval=-bound, maxval=bound)
    return w, b


if __name__ == "__main__":
    key = jax.random.PRNGKey(0)
    k_x, k_l1, k_l2 = jax.random.split(key, 3)

    # Small GIN-sized shapes; N chosen to exercise >1 grid step.
    N, IN_CH, OUT_CH = 256, 16, 32
    x = jax.random.normal(k_x, (N, IN_CH), jnp.float32)

    w1, b1 = init_linear_params(k_l1, IN_CH, OUT_CH)
    w2, b2 = init_linear_params(k_l2, OUT_CH, OUT_CH)

    out = mlp_forward(x, w1, b1, w2, b2)
    out = jax.block_until_ready(out)
    assert out.shape == (N, OUT_CH)

    # Pure-f32 reference matching the module semantics (Linear -> ReLU -> Linear).
    ref = jnp.maximum(x @ w1 + b1, 0.0) @ w2 + b2
    assert jnp.allclose(out, ref, atol=2e-3, rtol=2e-3), (
        float(jnp.max(jnp.abs(out - ref))))

    print("KERNEL_OK")
</pallas_src>

<mosaic_0001>
module attributes {stable_mosaic.version = 11 : i64} {
  func.func @mlp_kernel(%arg0: i32, %arg1: memref<128x16xf32, #tpu.memory_space<vmem>>, %arg2: memref<16x32xf32, #tpu.memory_space<vmem>>, %arg3: memref<1x32xf32, #tpu.memory_space<vmem>>, %arg4: memref<32x32xf32, #tpu.memory_space<vmem>>, %arg5: memref<1x32xf32, #tpu.memory_space<vmem>>, %arg6: memref<128x32xf32, #tpu.memory_space<vmem>>) attributes {dimension_semantics = [#tpu.dimension_semantics<parallel>], iteration_bounds = array<i64: 2>, scalar_prefetch = 0 : i64, scratch_operands = 0 : i64, tpu.core_type = #tpu.core_type<tc>, window_params = [{transform_indices = @transform_0, window_bounds = array<i64: 128, 16>}, {pipeline_mode = #tpu.pipeline_mode<synchronous>, transform_indices = @transform_1, window_bounds = array<i64: 16, 32>}, {pipeline_mode = #tpu.pipeline_mode<synchronous>, transform_indices = @transform_2, window_bounds = array<i64: 1, 32>}, {pipeline_mode = #tpu.pipeline_mode<synchronous>, transform_indices = @transform_3, window_bounds = array<i64: 32, 32>}, {pipeline_mode = #tpu.pipeline_mode<synchronous>, transform_indices = @transform_4, window_bounds = array<i64: 1, 32>}, {transform_indices = @transform_5, window_bounds = array<i64: 128, 32>}]} {
    %c0 = arith.constant 0 : index
    %c0_0 = arith.constant 0 : index
    %0 = vector.load %arg1[%c0, %c0_0] : memref<128x16xf32, #tpu.memory_space<vmem>>, vector<128x16xf32>
    %c0_1 = arith.constant 0 : index
    %c0_2 = arith.constant 0 : index
    %1 = vector.load %arg2[%c0_1, %c0_2] : memref<16x32xf32, #tpu.memory_space<vmem>>, vector<16x32xf32>
    %cst = arith.constant dense<0.000000e+00> : vector<128x32xf32>
    %2 = tpu.matmul %0, %1, %cst {dimension_numbers = #tpu.dot_dimension_numbers<[1], [0], [0], [1], [0, 0, 1, 1], [], []>} : vector<128x16xf32>, vector<16x32xf32>, vector<128x32xf32> -> vector<128x32xf32>
    %c0_3 = arith.constant 0 : index
    %c0_4 = arith.constant 0 : index
    %3 = vector.load %arg3[%c0_3, %c0_4] : memref<1x32xf32, #tpu.memory_space<vmem>>, vector<1x32xf32>
    %4 = vector.broadcast %3 : vector<1x32xf32> to vector<128x32xf32>
    %5 = arith.addf %2, %4 : vector<128x32xf32>
    %cst_5 = arith.constant 0.000000e+00 : f32
    %6 = vector.broadcast %cst_5 : f32 to vector<128x32xf32>
    %7 = arith.maximumf %5, %6 : vector<128x32xf32>
    %c0_6 = arith.constant 0 : index
    %c0_7 = arith.constant 0 : index
    %8 = vector.load %arg4[%c0_6, %c0_7] : memref<32x32xf32, #tpu.memory_space<vmem>>, vector<32x32xf32>
    %cst_8 = arith.constant dense<0.000000e+00> : vector<128x32xf32>
    %9 = tpu.matmul %7, %8, %cst_8 {dimension_numbers = #tpu.dot_dimension_numbers<[1], [0], [0], [1], [0, 0, 1, 1], [], []>} : vector<128x32xf32>, vector<32x32xf32>, vector<128x32xf32> -> vector<128x32xf32>
    %c0_9 = arith.constant 0 : index
    %c0_10 = arith.constant 0 : index
    %10 = vector.load %arg5[%c0_9, %c0_10] : memref<1x32xf32, #tpu.memory_space<vmem>>, vector<1x32xf32>
    %11 = vector.broadcast %10 : vector<1x32xf32> to vector<128x32xf32>
    %12 = arith.addf %9, %11 : vector<128x32xf32>
    %c0_11 = arith.constant 0 : index
    %c0_12 = arith.constant 0 : index
    %13 = vector.load %arg6[%c0_11, %c0_12] : memref<128x32xf32, #tpu.memory_space<vmem>>, vector<128x32xf32>
    tpu.vector_store %arg6[%c0_11, %c0_12], %12 {strides = array<i32>} : memref<128x32xf32, #tpu.memory_space<vmem>>, vector<128x32xf32>,
    return
  }
  func.func @transform_0(%arg0: i32) -> (i32, i32) {
    %c0_i32 = arith.constant 0 : i32
    %c0_i32_0 = arith.constant 0 : i32
    return %arg0, %c0_i32 : i32, i32
  }
  func.func @transform_1(%arg0: i32) -> (i32, i32) {
    %c0_i32 = arith.constant 0 : i32
    %c0_i32_0 = arith.constant 0 : i32
    %c0_i32_1 = arith.constant 0 : i32
    return %c0_i32, %c0_i32_0 : i32, i32
  }
  func.func @transform_2(%arg0: i32) -> (i32, i32) {
    %c0_i32 = arith.constant 0 : i32
    %c0_i32_0 = arith.constant 0 : i32
    %c0_i32_1 = arith.constant 0 : i32
    return %c0_i32, %c0_i32_0 : i32, i32
  }
  func.func @transform_3(%arg0: i32) -> (i32, i32) {
    %c0_i32 = arith.constant 0 : i32
    %c0_i32_0 = arith.constant 0 : i32
    %c0_i32_1 = arith.constant 0 : i32
    return %c0_i32, %c0_i32_0 : i32, i32
  }
  func.func @transform_4(%arg0: i32) -> (i32, i32) {
    %c0_i32 = arith.constant 0 : i32
    %c0_i32_0 = arith.constant 0 : i32
    %c0_i32_1 = arith.constant 0 : i32
    return %c0_i32, %c0_i32_0 : i32, i32
  }
  func.func @transform_5(%arg0: i32) -> (i32, i32) {
    %c0_i32 = arith.constant 0 : i32
    %c0_i32_0 = arith.constant 0 : i32
    return %arg0, %c0_i32 : i32, i32
  }
}

</mosaic_0001>

<bundles_post_ra>
// kernel: tpu_custom_call.1
= control target key start
LH: loop header
LB: loop body
LE: loop exit
PB: predicated region body
PF: predicated region fallthrough
CT: control target
= control target key end

     0   :  { %s941_s18 = smov 0   ;;  %s1073_s0 = inlined_call_operand.vmem [shape: f32[256,16], index: 0, kind: input, shape index: {}]   ;;  %s1074_s1 = inlined_call_operand.vmem [shape: f32[16,32], index: 1, kind: input, shape index: {}]   ;;  %s1075_s2 = inlined_call_operand.vmem [shape: f32[1,32], index: 2, kind: input, shape index: {}]   ;;  %s1076_s3 = inlined_call_operand.vmem [shape: f32[32,32], index: 3, kind: input, shape index: {}]   ;;  %s1077_s4 = inlined_call_operand.vmem [shape: f32[1,32], index: 4, kind: input, shape index: {}]   ;;  %s1078_s5 = inlined_call_operand.vmem [shape: f32[256,32], index: 5, kind: output, shape index: {}]  }
   0x1 LB: > { %s740_s19 = sadd.s32 4294967295, %s909_s18   ;;  %p744_p0 = scmp.ge.s32.totalorder %s909_s18, 1  ;;  %s909_s18 = sphi %s941_s18, %s15_s18  }
   0x2   : > { %p188_p1 = scmp.lt.s32.totalorder %s909_s18, 3 }
   0x4   : > { %p189_p2 = pnand %p744_p0, %p188_p1 }
   0x5   : > { %v244_v0 = vld [vmem:[%s1074_s1] sm:$0xff] (!%p189_p2)  ;;  %v245_v1 = vld [vmem:[%s1074_s1 + $0x8] sm:$0xff] (!%p189_p2)  ;;  %s745_s24 = sshll.u32 (!%p189_p2), %s740_s19, 4  ;;  %vm253_vm0 = vcmask (!%p189_p2), 130048   ;;  %v465_v22 = vld [vmem:[%s1076_s3 + $0x10] sm:$0xff] (!%p189_p2)  ;;  %vm474_vm1 = vcmask (!%p189_p2), 261120  }
   0x6   : > { %192 = sbr.rel (%p189_p2) target bundleno = 480 (0x1e0), region = 40  ;;  %v463_v2 = vld [vmem:[%s1076_s3] sm:$0xff] (!%p189_p2)  ;;  %v883_v3 = vpack.c.bf16 (!%p189_p2), %v245_v1, %v244_v0  ;;  %p217_p3 = scmp.lt.s32.totalorder (!%p189_p2), %s745_s24, 31  ;;  %v464_v4 = vld [vmem:[%s1076_s3 + $0x8] sm:$0xff] (!%p189_p2)  ;;  %v466_v23 = vld [vmem:[%s1076_s3 + $0x18] sm:$0xff] (!%p189_p2) }
   0x7   : > { %v887_v5 = vpack.c.bf16 (!%p189_p2), %v464_v4, %v463_v2  ;;  %v891_v24 = vpack.c.bf16 (!%p189_p2), %v466_v23, %v465_v22  ;;  %v749_v25 = vld [vmem:[%s1075_s2] ss:$0 sm:$0xff] (!%p189_p2) }
   0x8   : > { %884 = vmatprep.subr.bf16.mxu0 (!%p189_p2), %v883_v3 }
   0x9   : > { %886 = vmatpush3.bf16.msra.mxu0 (!%p189_p2), %v883_v3  ;;  %888 = vmatprep.subr.bf16.mxu1 (!%p189_p2), %v887_v5 }
   0xa   : > { %890 = vmatpush3.bf16.msra.mxu1 (!%p189_p2), %v887_v5 }
   0xb   : > { %892 = vmatprep.subr.bf16.mxu1 (!%p189_p2), %v891_v24 }
   0xd   : > { %s1080_s24 = smov (!%p217_p3, %s745_s24), 31 }
   0xe   : > { %s746_s29 = sshll.u32 %s1080_s24, 3  ;;  %894 = vmatpush3.bf16.msra.mxu1 %v891_v24 }
   0xf   : > { %s969_s7 = scalar_lea.vmem %s1073_s0, %s746_s29  ;;  %s1036_s19 = scalar_lea.vmem %s1078_s5, %s746_s29 }
  0x10   : > { %v228_v6 = vld [vmem:[%s969_s7] sm:$0xff]  ;;  %v229_v7 = vld [vmem:[%s969_s7 + $0x8] sm:$0xff]  ;;  %v230_v8 = vld [vmem:[%s969_s7 + $0x10] sm:$0xff] }
  0x11   : > { %827 = vmatprep.mubr.msk.f32.mxu0 %vm253_vm0, %v228_v6  ;;  %v231_v9 = vld [vmem:[%s969_s7 + $0x18] sm:$0xff]  ;;  %v232_v10 = vld [vmem:[%s969_s7 + $0x20] sm:$0xff]  ;;  %v233_v11 = vld [vmem:[%s969_s7 + $0x28] sm:$0xff] }
  0x12   : > { %828 = vmatmul.mubr.msk.f32.vlgmr.msra.gmra.mrb[0].mxu0 %vm253_vm0, %v229_v7  ;;  %v234_v12 = vld [vmem:[%s969_s7 + $0x30] sm:$0xff]  ;;  %v235_v13 = vld [vmem:[%s969_s7 + $0x38] sm:$0xff]  ;;  %v236_v14 = vld [vmem:[%s969_s7 + $0x40] sm:$0xff] }
  0x13   : > { %830 = vmatprep.mubr.msk.f32.mxu0 %vm253_vm0, %v230_v8  ;;  %v237_v15 = vld [vmem:[%s969_s7 + $0x48] sm:$0xff]  ;;  %v238_v16 = vld [vmem:[%s969_s7 + $0x50] sm:$0xff]  ;;  %v239_v17 = vld [vmem:[%s969_s7 + $0x58] sm:$0xff] }
  0x14   : > { %v240_v18 = vld [vmem:[%s969_s7 + $0x60] sm:$0xff]  ;;  %v241_v19 = vld [vmem:[%s969_s7 + $0x68] sm:$0xff]  ;;  %v242_v20 = vld [vmem:[%s969_s7 + $0x70] sm:$0xff] }
  0x15   : > { %v243_v21 = vld [vmem:[%s969_s7 + $0x78] sm:$0xff] }
  0x16   : > { %831 = vmatmul.mubr.msk.f32.gmra.mrb[2].mxu0 %vm253_vm0, %v231_v9 }
  0x17   : > { %833 = vmatprep.mubr.msk.f32.mxu0 %vm253_vm0, %v232_v10  ;;  %v766_v10 = vld [vmem:[%s1077_s4] ss:$0 sm:$0xff] }
  0x1a   : > { %834 = vmatmul.mubr.msk.f32.gmra.mrb[4].mxu0 %vm253_vm0, %v233_v11 }
  0x1b   : > { %836 = vmatprep.mubr.msk.f32.mxu0 %vm253_vm0, %v234_v12 }
  0x1e   : > { %837 = vmatmul.mubr.msk.f32.gmra.mrb[6].mxu0 %vm253_vm0, %v235_v13 }
  0x1f   : > { %839 = vmatprep.mubr.msk.f32.mxu0 %vm253_vm0, %v236_v14 }
  0x22   : > { %840 = vmatmul.mubr.msk.f32.gmra.mrb[8].mxu0 %vm253_vm0, %v237_v15 }
  0x23   : > { %842 = vmatprep.mubr.msk.f32.mxu0 %vm253_vm0, %v238_v16 }
  0x26   : > { %843 = vmatmul.mubr.msk.f32.gmra.mrb[10].mxu0 %vm253_vm0, %v239_v17 }
  0x27   : > { %845 = vmatprep.mubr.msk.f32.mxu0 %vm253_vm0, %v240_v18 }
  0x2a   : > { %846 = vmatmul.mubr.msk.f32.gmra.mrb[12].mxu0 %vm253_vm0, %v241_v19 }
  0x2b   : > { %848 = vmatprep.mubr.msk.f32.mxu0 %vm253_vm0, %v242_v20 }
  0x2e   : > { %849 = vmatmul.mubr.msk.f32.gmra.mrb[14].mxu0 %vm253_vm0, %v243_v21 }
  0xe5   : > { %v829_v26 = vpop.f32.mrb[0].mxu0 }
  0xe6   : > { %v374_v27 = vadd.f32 %v829_v26, %v749_v25  ;;  %v368_v28 = vpop.f32.mrb[1].mxu0 }
  0xe7   : > { %v369_v29 = vadd.f32 %v749_v25, %v368_v28 }
  0xe8   : > { %v448_v32 = vmax.f32 %v374_v27, 0.0 }
  0xe9   : > { %v447_v30 = vmax.f32 %v369_v29, 0.0  ;;  %v832_v31 = vpop.f32.mrb[2].mxu0 }
  0xea   : > { %v384_v33 = vadd.f32 %v832_v31, %v749_v25  ;;  %v378_v34 = vpop.f32.mrb[3].mxu0 }
  0xeb   : > { %v379_v35 = vadd.f32 %v749_v25, %v378_v34  ;;  %859 = vmatprep.mubr.msk.f32.mxu1 %vm474_vm1, %v447_v30 }
  0xec   : > { %860 = vmatmul.mubr.msk.f32.vlgmr.msra.gmra.mrb[0].mxu1 %vm474_vm1, %v448_v32  ;;  %v450_v38 = vmax.f32 %v384_v33, 0.0 }
  0xed   : > { %v449_v36 = vmax.f32 %v379_v35, 0.0  ;;  %v835_v37 = vpop.f32.mrb[4].mxu0 }
  0xee   : > { %v394_v39 = vadd.f32 %v835_v37, %v749_v25  ;;  %v388_v40 = vpop.f32.mrb[5].mxu0 }
  0xef   : > { %v389_v41 = vadd.f32 %v749_v25, %v388_v40  ;;  %862 = vmatprep.mubr.msk.f32.mxu1 %vm474_vm1, %v449_v36 }
  0xf0   : > { %863 = vmatmul.mubr.msk.f32.gmra.mrb[2].mxu1 %vm474_vm1, %v450_v38  ;;  %v452_v44 = vmax.f32 %v394_v39, 0.0 }
  0xf1   : > { %v451_v42 = vmax.f32 %v389_v41, 0.0  ;;  %v838_v43 = vpop.f32.mrb[6].mxu0 }
  0xf2   : > { %v404_v45 = vadd.f32 %v838_v43, %v749_v25  ;;  %v398_v46 = vpop.f32.mrb[7].mxu0 }
  0xf3   : > { %v399_v47 = vadd.f32 %v749_v25, %v398_v46  ;;  %865 = vmatprep.mubr.msk.f32.mxu1 %vm474_vm1, %v451_v42 }
  0xf4   : > { %866 = vmatmul.mubr.msk.f32.gmra.mrb[4].mxu1 %vm474_vm1, %v452_v44  ;;  %v454_v50 = vmax.f32 %v404_v45, 0.0 }
  0xf5   : > { %v453_v48 = vmax.f32 %v399_v47, 0.0  ;;  %v841_v49 = vpop.f32.mrb[8].mxu0 }
  0xf6   : > { %v414_v51 = vadd.f32 %v841_v49, %v749_v25  ;;  %v408_v52 = vpop.f32.mrb[9].mxu0 }
  0xf7   : > { %v409_v53 = vadd.f32 %v749_v25, %v408_v52  ;;  %868 = vmatprep.mubr.msk.f32.mxu1 %vm474_vm1, %v453_v48 }
  0xf8   : > { %869 = vmatmul.mubr.msk.f32.gmra.mrb[6].mxu1 %vm474_vm1, %v454_v50  ;;  %v456_v56 = vmax.f32 %v414_v51, 0.0 }
  0xf9   : > { %v455_v54 = vmax.f32 %v409_v53, 0.0  ;;  %v844_v55 = vpop.f32.mrb[10].mxu0 }
  0xfa   : > { %v424_v57 = vadd.f32 %v844_v55, %v749_v25  ;;  %v418_v58 = vpop.f32.mrb[11].mxu0 }
  0xfb   : > { %v419_v59 = vadd.f32 %v749_v25, %v418_v58  ;;  %871 = vmatprep.mubr.msk.f32.mxu1 %vm474_vm1, %v455_v54 }
  0xfc   : > { %872 = vmatmul.mubr.msk.f32.gmra.mrb[8].mxu1 %vm474_vm1, %v456_v56  ;;  %v458_v62 = vmax.f32 %v424_v57, 0.0 }
  0xfd   : > { %v457_v60 = vmax.f32 %v419_v59, 0.0  ;;  %v847_v61 = vpop.f32.mrb[12].mxu0 }
  0xfe   : > { %v434_v63 = vadd.f32 %v847_v61, %v749_v25  ;;  %v428_v0 = vpop.f32.mrb[13].mxu0 }
  0xff   : > { %v429_v1 = vadd.f32 %v749_v25, %v428_v0  ;;  %874 = vmatprep.mubr.msk.f32.mxu1 %vm474_vm1, %v457_v60 }
 0x100   : > { %875 = vmatmul.mubr.msk.f32.gmra.mrb[10].mxu1 %vm474_vm1, %v458_v62  ;;  %v460_v4 = vmax.f32 %v434_v63, 0.0 }
 0x101   : > { %v459_v2 = vmax.f32 %v429_v1, 0.0  ;;  %v850_v3 = vpop.f32.mrb[14].mxu0 }
 0x102   : > { %v444_v5 = vadd.f32 %v850_v3, %v749_v25  ;;  %v438_v6 = vpop.f32.mrb[15].mxu0 }
 0x103   : > { %v439_v7 = vadd.f32 %v749_v25, %v438_v6  ;;  %877 = vmatprep.mubr.msk.f32.mxu1 %vm474_vm1, %v459_v2 }
 0x104   : > { %878 = vmatmul.mubr.msk.f32.gmra.mrb[12].mxu1 %vm474_vm1, %v460_v4  ;;  %v462_v9 = vmax.f32 %v444_v5, 0.0 }
 0x105   : > { %v461_v8 = vmax.f32 %v439_v7, 0.0 }
 0x107   : > { %880 = vmatprep.mubr.msk.f32.mxu1 %vm474_vm1, %v461_v8 }
 0x108   : > { %881 = vmatmul.mubr.msk.f32.gmra.mrb[14].mxu1 %vm474_vm1, %v462_v9 }
 0x1bf   : > { %v861_v11 = vpop.f32.mrb[0].mxu1 }
 0x1c0   : > { %v595_v12 = vadd.f32 %v861_v11, %v766_v10  ;;  %v589_v13 = vpop.f32.mrb[1].mxu1 }
 0x1c1   : > { %v590_v14 = vadd.f32 %v766_v10, %v589_v13 }
 0x1c2   : > { %669 = vst.msk [vmem:[%s1036_s19 + $0x8] sm:$0xff] %vm474_vm1, %v595_v12 }
 0x1c3   : > { %668 = vst.msk [vmem:[%s1036_s19] sm:$0xff] %vm474_vm1, %v590_v14  ;;  %v864_v15 = vpop.f32.mrb[2].mxu1 }
 0x1c4   : > { %v605_v16 = vadd.f32 %v864_v15, %v766_v10  ;;  %v599_v17 = vpop.f32.mrb[3].mxu1 }
 0x1c5   : > { %v600_v18 = vadd.f32 %v766_v10, %v599_v17 }
 0x1c6   : > { %671 = vst.msk [vmem:[%s1036_s19 + $0x18] sm:$0xff] %vm474_vm1, %v605_v16 }
 0x1c7   : > { %670 = vst.msk [vmem:[%s1036_s19 + $0x10] sm:$0xff] %vm474_vm1, %v600_v18  ;;  %v867_v19 = vpop.f32.mrb[4].mxu1 }
 0x1c8   : > { %v615_v20 = vadd.f32 %v867_v19, %v766_v10  ;;  %v609_v21 = vpop.f32.mrb[5].mxu1 }
 0x1c9   : > { %v610_v22 = vadd.f32 %v766_v10, %v609_v21 }
 0x1ca   : > { %673 = vst.msk [vmem:[%s1036_s19 + $0x28] sm:$0xff] %vm474_vm1, %v615_v20 }
 0x1cb   : > { %672 = vst.msk [vmem:[%s1036_s19 + $0x20] sm:$0xff] %vm474_vm1, %v610_v22  ;;  %v870_v23 = vpop.f32.mrb[6].mxu1 }
 0x1cc   : > { %v625_v24 = vadd.f32 %v870_v23, %v766_v10  ;;  %v619_v25 = vpop.f32.mrb[7].mxu1 }
 0x1cd   : > { %v620_v26 = vadd.f32 %v766_v10, %v619_v25 }
 0x1ce   : > { %675 = vst.msk [vmem:[%s1036_s19 + $0x38] sm:$0xff] %vm474_vm1, %v625_v24 }
 0x1cf   : > { %674 = vst.msk [vmem:[%s1036_s19 + $0x30] sm:$0xff] %vm474_vm1, %v620_v26  ;;  %v873_v27 = vpop.f32.mrb[8].mxu1 }
 0x1d0   : > { %v635_v28 = vadd.f32 %v873_v27, %v766_v10  ;;  %v629_v29 = vpop.f32.mrb[9].mxu1 }
 0x1d1   : > { %v630_v30 = vadd.f32 %v766_v10, %v629_v29 }
 0x1d2   : > { %677 = vst.msk [vmem:[%s1036_s19 + $0x48] sm:$0xff] %vm474_vm1, %v635_v28 }
 0x1d3   : > { %676 = vst.msk [vmem:[%s1036_s19 + $0x40] sm:$0xff] %vm474_vm1, %v630_v30  ;;  %v876_v31 = vpop.f32.mrb[10].mxu1 }
 0x1d4   : > { %v645_v32 = vadd.f32 %v876_v31, %v766_v10  ;;  %v639_v33 = vpop.f32.mrb[11].mxu1 }
 0x1d5   : > { %v640_v34 = vadd.f32 %v766_v10, %v639_v33 }
 0x1d6   : > { %679 = vst.msk [vmem:[%s1036_s19 + $0x58] sm:$0xff] %vm474_vm1, %v645_v32 }
 0x1d7   : > { %678 = vst.msk [vmem:[%s1036_s19 + $0x50] sm:$0xff] %vm474_vm1, %v640_v34  ;;  %v879_v35 = vpop.f32.mrb[12].mxu1 }
 0x1d8   : > { %v655_v36 = vadd.f32 %v879_v35, %v766_v10  ;;  %v649_v37 = vpop.f32.mrb[13].mxu1 }
 0x1d9   : > { %v650_v38 = vadd.f32 %v766_v10, %v649_v37 }
 0x1da   : > { %681 = vst.msk [vmem:[%s1036_s19 + $0x68] sm:$0xff] %vm474_vm1, %v655_v36 }
 0x1db   : > { %680 = vst.msk [vmem:[%s1036_s19 + $0x60] sm:$0xff] %vm474_vm1, %v650_v38  ;;  %v882_v39 = vpop.f32.mrb[14].mxu1 }
 0x1dc   : > { %v665_v40 = vadd.f32 %v882_v39, %v766_v10  ;;  %v659_v41 = vpop.f32.mrb[15].mxu1 }
 0x1dd   : > { %v660_v42 = vadd.f32 %v766_v10, %v659_v41 }
 0x1de   : > { %683 = vst.msk [vmem:[%s1036_s19 + $0x78] sm:$0xff] %vm474_vm1, %v665_v40 }
 0x1df   : > { %682 = vst.msk [vmem:[%s1036_s19 + $0x70] sm:$0xff] %vm474_vm1, %v660_v42 }
 0x1e0 PF: > { %s15_s18 = sadd.s32 1, %s909_s18  }
 0x1e1   : > { %p12_p4 = scmp.ge.s32.totalorder %s15_s18, 4  }
 0x1e3   :  { %14 = sbr.rel (!%p12_p4) target bundleno = 1 (0x1), region = 70 }

</bundles_post_ra>
